<compile_context>
chip_gen: v7x
topology: tpu7x:2x2x1
jax: 0.10.0
libtpu: 0.0.40
codegen_flags: <defaults>
</compile_context>

<pallas_src>
import jax
import jax.numpy as jnp
from jax import lax
from jax.experimental import pallas as pl
from jax.experimental.pallas import tpu as pltpu


def _round_up(x, m):
    return ((x + m - 1) // m) * m


def matching_kernel(xs_ref, xq_ref, w_ref, b_ref, onehot_ref, out_ref):
    """Fused embed + matching-network readout.

    xs_ref:     (S, F)     flattened support images
    xq_ref:     (Q, F)     flattened query images
    w_ref:      (F, D)     embedding projection weight
    b_ref:      (1, D)     embedding projection bias
    onehot_ref: (S, Cpad)  one-hot support labels, zero-padded to lane width
    out_ref:    (Q, Cpad)  out[q, c] = sum_s cos(fX_q, gS_s) * onehot[s, c]
    """
    eps = jnp.float32(1e-8)  # nn.CosineSimilarity default eps

    xs = xs_ref[...]
    xq = xq_ref[...]
    w = w_ref[...]
    b = b_ref[...]

    # --- fused synthetic embedding (MXU) ---------------------------------
    gs = lax.dot_general(xs, w, (((1,), (0,)), ((), ())),
                         preferred_element_type=jnp.float32) + b   # (S, D)
    fx = lax.dot_general(xq, w, (((1,), (0,)), ((), ())),
                         preferred_element_type=jnp.float32) + b   # (Q, D)

    # --- pre-normalize with rsqrt (EUP), then one NT matmul gives cosines.
    # NOTE: PyTorch CosineSimilarity clamps the *product* |x||y| to eps;
    # per-vector clamping below differs only for near-zero embeddings.
    gs_n = gs * lax.rsqrt(
        jnp.maximum(jnp.sum(gs * gs, axis=-1, keepdims=True), eps * eps))
    fx_n = fx * lax.rsqrt(
        jnp.maximum(jnp.sum(fx * fx, axis=-1, keepdims=True), eps * eps))

    # Pairwise cosine similarities: 'qd,kd->qk' — no materialized transpose.
    cos = lax.dot_general(fx_n, gs_n, (((1,), (1,)), ((), ())),
                          preferred_element_type=jnp.float32)       # (Q, S)

    # out = cos @ one_hot  ==  expandOneHot.mul(expandWeights).sum(1)
    # Lane-dense (Cpad = 128 multiple) so the store is an unmasked vst.
    out_ref[...] = jnp.dot(cos, onehot_ref[...],
                           preferred_element_type=jnp.float32)      # (Q, Cpad)


def matching_net_readout(xs_flat, xq_flat, w_embed, b_embed, one_hot_padded):
    S, F = xs_flat.shape
    Q, _ = xq_flat.shape
    D = w_embed.shape[1]
    Cpad = one_hot_padded.shape[1]

    return pl.pallas_call(
        matching_kernel,
        out_shape=jax.ShapeDtypeStruct((Q, Cpad), jnp.float32),
        # Single invocation; full-array blocks (shapes are small, fit VMEM).
        in_specs=[
            pl.BlockSpec((S, F), lambda: (0, 0)),
            pl.BlockSpec((Q, F), lambda: (0, 0)),
            pl.BlockSpec((F, D), lambda: (0, 0)),
            pl.BlockSpec((1, D), lambda: (0, 0)),
            pl.BlockSpec((S, Cpad), lambda: (0, 0)),
        ],
        out_specs=pl.BlockSpec((Q, Cpad), lambda: (0, 0)),
        compiler_params=pltpu.CompilerParams(
            vmem_limit_bytes=32 * 1024 * 1024),
    )(xs_flat, xq_flat, w_embed, b_embed, one_hot_padded)


def matching_net_forward(params, opt, inputs, training=True):
    """Mirrors MatchingNet.forward."""
    train_input = inputs["trainInput"]    # (S, C_in, H, W)  NCHW
    train_target = inputs["trainTarget"]  # (S,)  int labels
    test_input = inputs["testInput"]      # (Q, C_in, H, W)  NCHW
    test_target = inputs["testTarget"]    # (Q,)  int labels

    n_classes = opt["nClasses"]["train"]

    # Flatten NCHW images; the linear embedding itself runs inside the kernel.
    xs_flat = train_input.reshape(train_input.shape[0], -1).astype(jnp.float32)
    xq_flat = test_input.reshape(test_input.shape[0], -1).astype(jnp.float32)

    # One-hot of support labels (scatter_ in the original), padded to a
    # lane-dense class dimension; padded columns are zero so they contribute
    # nothing and are sliced off after the kernel.
    c_pad = _round_up(n_classes, 128)
    y_one_hot = jax.nn.one_hot(train_target, n_classes, dtype=jnp.float32)
    y_one_hot_padded = jnp.pad(y_one_hot,
                               ((0, 0), (0, c_pad - n_classes)))    # (S, Cpad)

    b_embed_2d = params["b_embed"].reshape(1, -1).astype(jnp.float32)

    out_padded = matching_net_readout(
        xs_flat, xq_flat,
        params["W_embed"].astype(jnp.float32),
        b_embed_2d,
        y_one_hot_padded,
    )                                                               # (Q, Cpad)
    out = out_padded[:, :n_classes]                                 # (Q, C)

    if training:
        # nn.CrossEntropyLoss on `out` vs testTarget (tiny glue op, plain JAX).
        logp = jax.nn.log_softmax(out, axis=-1)
        loss = -jnp.mean(jnp.take_along_axis(logp, test_target[:, None], axis=1))
        return out, loss
    return out


if __name__ == "__main__":
    key = jax.random.PRNGKey(0)

    # Small shapes: 4 classes, 8 support (2 per class), 8 queries,
    # images (N, 4, 8, 8), embedding dim 32.
    n_classes = 4
    n_support = 8
    n_query = 8
    c_in, h, w = 4, 8, 8
    embed_dim = 32

    k1, k2, k3, k4 = jax.random.split(key, 4)
    train_input = jax.random.normal(k1, (n_support, c_in, h, w), dtype=jnp.float32)
    test_input = jax.random.normal(k2, (n_query, c_in, h, w), dtype=jnp.float32)
    train_target = jnp.tile(jnp.arange(n_classes, dtype=jnp.int32),
                            n_support // n_classes)
    test_target = jax.random.randint(k3, (n_query,), 0, n_classes, dtype=jnp.int32)

    # Deterministic synthetic embedding parameters.
    in_dim = c_in * h * w
    params = {
        "W_embed": jax.random.normal(k4, (in_dim, embed_dim), dtype=jnp.float32)
        * (1.0 / jnp.sqrt(in_dim)),
        "b_embed": jnp.zeros((embed_dim,), dtype=jnp.float32),
    }

    opt = {"nClasses": {"train": n_classes}, "steps": 1}
    inputs = {
        "trainInput": train_input,
        "trainTarget": train_target,
        "testInput": test_input,
        "testTarget": test_target,
    }

    out, loss = matching_net_forward(params, opt, inputs, training=True)
    out = jax.block_until_ready(out)
    loss = jax.block_until_ready(loss)

    # Sanity check against a pure-JAX reference of the matching readout
    # (exact PyTorch CosineSimilarity semantics: clamp |x||y| product to eps).
    def ref_readout(gs, fx, oh, eps=1e-8):
        dots = fx @ gs.T
        denom = jnp.maximum(
            jnp.linalg.norm(fx, axis=-1, keepdims=True)
            * jnp.linalg.norm(gs, axis=-1, keepdims=True).T,
            eps,
        )
        return (dots / denom) @ oh

    gS_ref = (train_input.reshape(n_support, -1) @ params["W_embed"]) + params["b_embed"]
    fX_ref = (test_input.reshape(n_query, -1) @ params["W_embed"]) + params["b_embed"]
    oh_ref = jax.nn.one_hot(train_target, n_classes, dtype=jnp.float32)
    expected = ref_readout(gS_ref, fX_ref, oh_ref)
    assert jnp.allclose(out, expected, atol=1e-4, rtol=1e-4), "mismatch vs reference"
    assert out.shape == (n_query, n_classes)
    assert jnp.isfinite(loss)

    print("KERNEL_OK")
</pallas_src>

<mosaic_0001>
module attributes {stable_mosaic.version = 11 : i64} {
  func.func @matching_kernel(%arg0: memref<8x256xf32, #tpu.memory_space<vmem>>, %arg1: memref<8x256xf32, #tpu.memory_space<vmem>>, %arg2: memref<256x32xf32, #tpu.memory_space<vmem>>, %arg3: memref<1x32xf32, #tpu.memory_space<vmem>>, %arg4: memref<8x128xf32, #tpu.memory_space<vmem>>, %arg5: memref<8x128xf32, #tpu.memory_space<vmem>>) attributes {dimension_semantics = [], scalar_prefetch = 0 : i64, scratch_operands = 0 : i64, tpu.core_type = #tpu.core_type<tc>} {
    %c0 = arith.constant 0 : index
    %c0_0 = arith.constant 0 : index
    %0 = vector.load %arg0[%c0, %c0_0] : memref<8x256xf32, #tpu.memory_space<vmem>>, vector<8x256xf32>
    %c0_1 = arith.constant 0 : index
    %c0_2 = arith.constant 0 : index
    %1 = vector.load %arg1[%c0_1, %c0_2] : memref<8x256xf32, #tpu.memory_space<vmem>>, vector<8x256xf32>
    %c0_3 = arith.constant 0 : index
    %c0_4 = arith.constant 0 : index
    %2 = vector.load %arg2[%c0_3, %c0_4] : memref<256x32xf32, #tpu.memory_space<vmem>>, vector<256x32xf32>
    %c0_5 = arith.constant 0 : index
    %c0_6 = arith.constant 0 : index
    %3 = vector.load %arg3[%c0_5, %c0_6] : memref<1x32xf32, #tpu.memory_space<vmem>>, vector<1x32xf32>
    %cst = arith.constant dense<0.000000e+00> : vector<8x32xf32>
    %4 = tpu.matmul %0, %2, %cst {dimension_numbers = #tpu.dot_dimension_numbers<[1], [0], [0], [1], [0, 0, 1, 1], [], []>} : vector<8x256xf32>, vector<256x32xf32>, vector<8x32xf32> -> vector<8x32xf32>
    %5 = vector.broadcast %3 : vector<1x32xf32> to vector<8x32xf32>
    %6 = arith.addf %4, %5 : vector<8x32xf32>
    %cst_7 = arith.constant dense<0.000000e+00> : vector<8x32xf32>
    %7 = tpu.matmul %1, %2, %cst_7 {dimension_numbers = #tpu.dot_dimension_numbers<[1], [0], [0], [1], [0, 0, 1, 1], [], []>} : vector<8x256xf32>, vector<256x32xf32>, vector<8x32xf32> -> vector<8x32xf32>
    %8 = vector.broadcast %3 : vector<1x32xf32> to vector<8x32xf32>
    %9 = arith.addf %7, %8 : vector<8x32xf32>
    %10 = arith.mulf %6, %6 : vector<8x32xf32>
    %cst_8 = arith.constant dense<0.000000e+00> : vector<8xf32>
    %11 = vector.multi_reduction <add>, %10, %cst_8 [1] : vector<8x32xf32> to vector<8xf32>
    %12 = vector.shape_cast %11 : vector<8xf32> to vector<8x1xf32>
    %cst_9 = arith.constant 9.99999993E-9 : f32
    %cst_10 = arith.constant 9.99999993E-9 : f32
    %13 = arith.mulf %cst_9, %cst_10 : f32
    %14 = vector.broadcast %13 : f32 to vector<8x1xf32>
    %15 = arith.maximumf %12, %14 : vector<8x1xf32>
    %16 = math.rsqrt %15 : vector<8x1xf32>
    %17 = vector.broadcast %16 : vector<8x1xf32> to vector<8x32xf32>
    %18 = arith.mulf %6, %17 : vector<8x32xf32>
    %19 = arith.mulf %9, %9 : vector<8x32xf32>
    %cst_11 = arith.constant dense<0.000000e+00> : vector<8xf32>
    %20 = vector.multi_reduction <add>, %19, %cst_11 [1] : vector<8x32xf32> to vector<8xf32>
    %21 = vector.shape_cast %20 : vector<8xf32> to vector<8x1xf32>
    %cst_12 = arith.constant 9.99999993E-9 : f32
    %cst_13 = arith.constant 9.99999993E-9 : f32
    %22 = arith.mulf %cst_12, %cst_13 : f32
    %23 = vector.broadcast %22 : f32 to vector<8x1xf32>
    %24 = arith.maximumf %21, %23 : vector<8x1xf32>
    %25 = math.rsqrt %24 : vector<8x1xf32>
    %26 = vector.broadcast %25 : vector<8x1xf32> to vector<8x32xf32>
    %27 = arith.mulf %9, %26 : vector<8x32xf32>
    %cst_14 = arith.constant dense<0.000000e+00> : vector<8x8xf32>
    %28 = tpu.matmul %27, %18, %cst_14 {dimension_numbers = #tpu.dot_dimension_numbers<[1], [1], [0], [0], [0, 0, 1, 0], [], []>} : vector<8x32xf32>, vector<8x32xf32>, vector<8x8xf32> -> vector<8x8xf32>
    %c0_15 = arith.constant 0 : index
    %c0_16 = arith.constant 0 : index
    %29 = vector.load %arg4[%c0_15, %c0_16] : memref<8x128xf32, #tpu.memory_space<vmem>>, vector<8x128xf32>
    %cst_17 = arith.constant dense<0.000000e+00> : vector<8x128xf32>
    %30 = tpu.matmul %28, %29, %cst_17 {dimension_numbers = #tpu.dot_dimension_numbers<[1], [0], [0], [1], [0, 0, 1, 1], [], []>} : vector<8x8xf32>, vector<8x128xf32>, vector<8x128xf32> -> vector<8x128xf32>
    %c0_18 = arith.constant 0 : index
    %c0_19 = arith.constant 0 : index
    %31 = vector.load %arg5[%c0_18, %c0_19] : memref<8x128xf32, #tpu.memory_space<vmem>>, vector<8x128xf32>
    tpu.vector_store %arg5[%c0_18, %c0_19], %30 {strides = array<i32>} : memref<8x128xf32, #tpu.memory_space<vmem>>, vector<8x128xf32>,
    return
  }
}

</mosaic_0001>

<bundles_post_ra>
// kernel: tpu_custom_call.1
= control target key start
LH: loop header
LB: loop body
LE: loop exit
PB: predicated region body
PF: predicated region fallthrough
CT: control target
= control target key end

     0   :  { %s731_s0 = inlined_call_operand.vmem [shape: f32[8,256], index: 0, kind: input, shape index: {}]   ;;  %s732_s1 = inlined_call_operand.vmem [shape: f32[8,256], index: 1, kind: input, shape index: {}]   ;;  %s733_s2 = inlined_call_operand.vmem [shape: f32[256,32], index: 2, kind: input, shape index: {}]   ;;  %s734_s3 = inlined_call_operand.vmem [shape: f32[1,32], index: 3, kind: input, shape index: {}]   ;;  %s735_s4 = inlined_call_operand.vmem [shape: f32[8,128], index: 4, kind: input, shape index: {}]   ;;  %s736_s5 = inlined_call_operand.hbm [shape: f32[8,128], index: 5, kind: output, shape index: {}]  }
   0x1   :  { %v41_v0 = vld [vmem:[%s733_s2 + $0x80] sm:$0xff]  ;;  %v42_v1 = vld [vmem:[%s733_s2 + $0x88] sm:$0xff]  ;;  %v43_v5 = vld [vmem:[%s733_s2 + $0x90] sm:$0xff] }
   0x2   :  { %v25_v2 = vld [vmem:[%s733_s2] sm:$0xff]  ;;  %v473_v3 = vpack.c.bf16 %v42_v1, %v41_v0  ;;  %v26_v4 = vld [vmem:[%s733_s2 + $0x8] sm:$0xff]  ;;  %v44_v6 = vld [vmem:[%s733_s2 + $0x98] sm:$0xff] }
   0x3   :  { %v475_v7 = vpack.c.bf16 %v26_v4, %v25_v2  ;;  %v477_v8 = vpack.c.bf16 %v44_v6, %v43_v5  ;;  %v27_v9 = vld [vmem:[%s733_s2 + $0x10] sm:$0xff]  ;;  %v28_v10 = vld [vmem:[%s733_s2 + $0x18] sm:$0xff]  ;;  %v45_v11 = vld [vmem:[%s733_s2 + $0xa0] sm:$0xff] }
   0x4   :  { %474 = vmatprep.subr.bf16.mxu0 %v473_v3  ;;  %506 = vmatprep.subr.bf16.mxu1 %v473_v3  ;;  %v46_v12 = vld [vmem:[%s733_s2 + $0xa8] sm:$0xff]  ;;  %v479_v13 = vpack.c.bf16 %v28_v10, %v27_v9  ;;  %v29_v15 = vld [vmem:[%s733_s2 + $0x20] sm:$0xff]  ;;  %v47_v17 = vld [vmem:[%s733_s2 + $0xb0] sm:$0xff] }
   0x5   :  { %476 = vmatpush3.bf16.msra.mxu0 %v475_v7  ;;  %508 = vmatpush3.bf16.msra.mxu1 %v475_v7  ;;  %v481_v14 = vpack.c.bf16 %v46_v12, %v45_v11  ;;  %v30_v16 = vld [vmem:[%s733_s2 + $0x28] sm:$0xff]  ;;  %v48_v18 = vld [vmem:[%s733_s2 + $0xb8] sm:$0xff]  ;;  %v31_v21 = vld [vmem:[%s733_s2 + $0x30] sm:$0xff] }
   0x6   :  { %478 = vmatprep.subr.bf16.mxu0 %v477_v8  ;;  %510 = vmatprep.subr.bf16.mxu1 %v477_v8  ;;  %v483_v19 = vpack.c.bf16 %v30_v16, %v29_v15  ;;  %v485_v20 = vpack.c.bf16 %v48_v18, %v47_v17  ;;  %v32_v22 = vld [vmem:[%s733_s2 + $0x38] sm:$0xff]  ;;  %v49_v23 = vld [vmem:[%s733_s2 + $0xc0] sm:$0xff]  ;;  %v50_v24 = vld [vmem:[%s733_s2 + $0xc8] sm:$0xff] }
   0x7   :  { %v22_v25 = vld [vmem:[%s731_s0 + $0x8] sm:$0xff]  ;;  %v487_v27 = vpack.c.bf16 %v32_v22, %v31_v21 }
   0x8   :  { %128 = vmatprep.mubr.f32.mxu0 %v22_v25  ;;  %v24_v26 = vld [vmem:[%s732_s1 + $0x8] sm:$0xff] }
   0x9   :  { %480 = vmatpush3.bf16.msra.mxu0 %v479_v13  ;;  %512 = vmatpush3.bf16.msra.mxu1 %v479_v13 }
   0xa   :  { %482 = vmatprep.subr.bf16.mxu0 %v481_v14  ;;  %514 = vmatprep.subr.bf16.mxu1 %v481_v14 }
   0xd   :  { %484 = vmatpush3.bf16.msra.mxu0 %v483_v19  ;;  %516 = vmatpush3.bf16.msra.mxu1 %v483_v19 }
   0xe   :  { %10 = vsyncpa [#allocation3], 0  ;;  %486 = vmatprep.subr.bf16.mxu0 %v485_v20  ;;  %518 = vmatprep.subr.bf16.mxu1 %v485_v20  ;;  %v489_v28 = vpack.c.bf16 %v50_v24, %v49_v23  ;;  %v33_v29 = vld [vmem:[%s733_s2 + $0x40] sm:$0xff]  ;;  %v34_v30 = vld [vmem:[%s733_s2 + $0x48] sm:$0xff]  ;;  %vm205_vm0 = vcmask 261120   ;;  %v568_v1 = vmov 0.0  }
   0xf   :  { %v51_v31 = vld [vmem:[%s733_s2 + $0xd0] sm:$0xff]  ;;  %v52_v32 = vld [vmem:[%s733_s2 + $0xd8] sm:$0xff]  ;;  %198 = vmatprep.mubr.f32.mxu1 %v24_v26  ;;  %v491_v33 = vpack.c.bf16 %v34_v30, %v33_v29  ;;  %v53_v37 = vld [vmem:[%s733_s2 + $0xe0] sm:$0xff]  ;;  %vm569_vm1 = vmmov 0   ;;  %vm296_vm2 = vcmask 64512  }
  0x10   :  { %v493_v34 = vpack.c.bf16 %v52_v32, %v51_v31  ;;  %v35_v35 = vld [vmem:[%s733_s2 + $0x50] sm:$0xff]  ;;  %v36_v36 = vld [vmem:[%s733_s2 + $0x58] sm:$0xff]  ;;  %v54_v38 = vld [vmem:[%s733_s2 + $0xe8] sm:$0xff] }
  0x11   :  { %488 = vmatpush3.bf16.msra.mxu0 %v487_v27  ;;  %520 = vmatpush3.bf16.msra.mxu1 %v487_v27  ;;  %v495_v39 = vpack.c.bf16 %v36_v36, %v35_v35  ;;  %v497_v40 = vpack.c.bf16 %v54_v38, %v53_v37  ;;  %v37_v41 = vld [vmem:[%s733_s2 + $0x60] sm:$0xff]  ;;  %v38_v42 = vld [vmem:[%s733_s2 + $0x68] sm:$0xff]  ;;  %v55_v43 = vld [vmem:[%s733_s2 + $0xf0] sm:$0xff] }
  0x12   :  { %490 = vmatprep.subr.bf16.mxu0 %v489_v28  ;;  %522 = vmatprep.subr.bf16.mxu1 %v489_v28  ;;  %v56_v44 = vld [vmem:[%s733_s2 + $0xf8] sm:$0xff]  ;;  %v499_v45 = vpack.c.bf16 %v38_v42, %v37_v41  ;;  %v39_v47 = vld [vmem:[%s733_s2 + $0x70] sm:$0xff]  ;;  %v21_v50 = vld [vmem:[%s731_s0] sm:$0xff] }
  0x13   :  { %v501_v46 = vpack.c.bf16 %v56_v44, %v55_v43  ;;  %v40_v48 = vld [vmem:[%s733_s2 + $0x78] sm:$0xff]  ;;  %v23_v51 = vld [vmem:[%s732_s1] sm:$0xff] }
  0x14   :  { %v503_v49 = vpack.c.bf16 %v40_v48, %v39_v47  ;;  %v385_v54 = vld [vmem:[%s734_s3] ss:$0 sm:$0xff]  ;;  %s570_s3 = smov [#allocation2]  }
  0x15   :  { %492 = vmatpush3.bf16.msra.mxu0 %v491_v33  ;;  %524 = vmatpush3.bf16.msra.mxu1 %v491_v33  ;;  %v295_v2 = vld [vmem:[%s735_s4] sm:$0xff]  ;;  %s377_s4 = sshll.u32 %s570_s3, 4  ;;  %s378_s4 = int_to_ptr.vmem [resolvable:$true] %s377_s4 }
  0x16   :  { %494 = vmatprep.subr.bf16.mxu0 %v493_v34  ;;  %526 = vmatprep.subr.bf16.mxu1 %v493_v34  ;;  %s544_s16 = scalar_lea.vmem %s378_s4, 128  ;;  %p549_p1 = scmp.lt.s32.totalorder %s378_s4, %s378_s4 }
  0x17   :  { %p545_p0 = scmp.ne.s32.totalorder %s378_s4, %s544_s16  ;;  %p550_p2 = scmp.lt.s32.totalorder %s544_s16, %s544_s16 }
  0x19   :  { %496 = vmatpush3.bf16.msra.mxu0 %v495_v39  ;;  %528 = vmatpush3.bf16.msra.mxu1 %v495_v39  ;;  %p551_p3 = por %p550_p2, %p549_p1 }
  0x1a   :  { %498 = vmatprep.subr.bf16.mxu0 %v497_v40  ;;  %530 = vmatprep.subr.bf16.mxu1 %v497_v40 }
  0x1b   :  { %p552_p4 = pnand %p551_p3, %p545_p0 }
  0x1d   :  { %500 = vmatpush3.bf16.msra.mxu0 %v499_v45  ;;  %532 = vmatpush3.bf16.msra.mxu1 %v499_v45 }
  0x1e   :  { %502 = vmatprep.subr.bf16.mxu0 %v501_v46  ;;  %534 = vmatprep.subr.bf16.mxu1 %v501_v46 }
  0x21   :  { %504 = vmatpush3.bf16.msra.mxu0 %v503_v49  ;;  %536 = vmatpush3.bf16.msra.mxu1 %v503_v49 }
  0x22   :  { %463 = vmatprep.subr.mxu0 %v568_v1  ;;  %468 = vmatprep.subr.mxu1 %v568_v1 }
  0x24   :  { %129 = vmatmul.mubr.f32.vlgmr.msra.gmra.mrb[0].mxu0 %v21_v50  ;;  %199 = vmatmul.mubr.f32.vlgmr.msra.gmra.mrb[0].mxu1 %v23_v51 }
  0x25   :  { %465 = vmatprep.mubr.msk.f32.mxu0 %vm569_vm1, %v568_v1  ;;  %470 = vmatprep.mubr.msk.f32.mxu1 %vm569_vm1, %v568_v1 }
  0x26   :  { %469 = vmatpush3.msra.mxu1 %v295_v2 }
  0xf7   :  { %v421_v52 = vpop.f32.mrb[0].mxu0  ;;  %v456_v53 = vpop.f32.mrb[0].mxu1 }
  0xf8   :  { %v422_v55 = vpop.f32.mrb[1].mxu0  ;;  %v457_v56 = vpop.f32.mrb[1].mxu1 }
  0xf9   :  { %v423_v57 = vadd.f32 %v422_v55, %v421_v52  ;;  %v458_v58 = vadd.f32 %v457_v56, %v456_v53 }
  0xfb   :  { %v131_v59 = vadd.f32 %v423_v57, %v385_v54  ;;  %v201_v60 = vadd.f32 %v458_v58, %v385_v54 }
  0xfd   :  { %v204_v61 = vmul.f32 %v131_v59, %v131_v59  ;;  %v212_v62 = vmul.f32 %v201_v60, %v201_v60 }
  0xff   :  { %v206_v63 = vsel %vm205_vm0, %v204_v61, 0.0  ;;  %v213_v0 = vsel %vm205_vm0, %v212_v62, 0.0 }
 0x100   :  { %207 = vadd.xlane.f32.xlu0 %v206_v63 }
 0x104   :  { %214 = vadd.xlane.f32.xlu0 %v213_v0 }
 0x18d   :  { %v208_v3 = vpop.xlane.xlu0 %207 }
 0x18e   :  { %v209_v4 = vmax.f32 %v208_v3, 1e-16 }
 0x190   :  { %540 = vrsqrt.f32 %v209_v4 }
 0x191   :  { %v215_v5 = vpop.xlane.xlu0 %214 }
 0x192   :  { %v216_v6 = vmax.f32 %v215_v5, 1e-16 }
 0x194   :  { %542 = vrsqrt.f32 %v216_v6 }
 0x19a   :  { %v541_v7 = vpop.eup %540 }
 0x19b   :  { %v211_v8 = vmul.f32 %v541_v7, %v131_v59 }
 0x19d   :  { %464 = vmatpush3.xpose.msk.msra.mxu0 %vm205_vm0, %v211_v8 }
 0x19e   :  { %v543_v9 = vpop.eup %542 }
 0x19f   :  { %v218_v10 = vmul.f32 %v543_v9, %v201_v60 }
 0x1a1   :  { %466 = vmatmul.mubr.msk.f32.vlgmr.msra.gmra.mrb[2].mxu0 %vm205_vm0, %v218_v10 }
 0x274   :  { %v291_v11 = vpop.f32.mrb[2].mxu0 }
 0x275   :  { %v467_v12 = vpop.f32.mrb[3].mxu0  ;;  %471 = vmatmul.mubr.msk.f32.vlgmr.msra.gmra.mrb[2].mxu1 %vm296_vm2, %v291_v11 }
 0x348   :  { %v366_v13 = vpop.f32.mrb[2].mxu1 }
 0x349   :  { %370 = vst [vmem:[#allocation2] sm:$0xff] %v366_v13  ;;  %v472_v14 = vpop.f32.mrb[3].mxu1 }
 0x34a   :  { %555 = shalt.err (!%p552_p4)
}
 0x34b   :  { %s556_s19 = scalar_lea.hbm %s736_s5, 128 }
 0x34c   :  { %p557_p5 = scmp.ne.s32.totalorder %s736_s5, %s556_s19  ;;  %p560_p6 = scmp.lt.u32.totalorder %s556_s19, %s736_s5 }
 0x34e   :  { %p562_p7 = pnand %p560_p6, %p557_p5 }
 0x350   :  { %565 = shalt.err (!%p562_p7)
}
 0x351   :  { %380 = dma.vmem_to_hbm [thread:$0]  %s378_s4, 128, %s736_s5, [#allocation3]  }
 0x352   :  { %566 = dma.done.wait [#allocation3], 128  }
 0x353   :  { %567 = vsyncadd [#allocation3], 4294967168 }
 0x354   :  { %384 = vsyncpa [#allocation3], 1 }

</bundles_post_ra>
